<compile_context>
chip_gen: v7x
topology: tpu7x:2x2x1
jax: 0.10.0
libtpu: 0.0.40
codegen_flags: <defaults>
</compile_context>

<pallas_src>
import math
import functools

import jax
import jax.numpy as jnp
from jax.experimental import pallas as pl
from jax.experimental.pallas import tpu as pltpu


def _cross_attn_kernel(q_ref, k_ref, qw_ref, qb_ref, kw_ref, vw_ref,
                       pw_ref, pb_ref, o_ref, *, num_heads):
    """One batch element per grid step.

    q_ref : (N, Dq)   activation tile (pipelined)
    k_ref : (N, Dk)   activation tile (pipelined)
    qw/qb : (Dq, Dk) / (1, Dk)   q projection (scale pre-folded), resident in VMEM
    kw/vw : (Dk, Dk)             k / v projections, resident in VMEM
    pw/pb : (Dk, Dpad) / (1, Dpad)  output projection (lane-dense padded), resident
    o_ref : (N, Dpad)  output tile
    """
    f32 = jnp.float32
    dt = q_ref.dtype
    n = q_ref.shape[0]
    dk = qw_ref.shape[1]
    hd = dk // num_heads

    q2d = q_ref[...]                                   # (N, Dq)
    k2d = k_ref[...]                                   # (N, Dk)

    # --- full-width, lane-dense projections (MXU), f32 accumulation -------------
    qp = jnp.dot(q2d, qw_ref[...], preferred_element_type=f32) + qb_ref[...]
    kp = jnp.dot(k2d, kw_ref[...], preferred_element_type=f32)
    vp = jnp.dot(k2d, vw_ref[...], preferred_element_type=f32)

    # --- split heads once: (N, H*hd) -> (H, N, hd) -------------------------------
    qh = jnp.transpose(qp.reshape(n, num_heads, hd), (1, 0, 2)).astype(dt)
    kh = jnp.transpose(kp.reshape(n, num_heads, hd), (1, 0, 2)).astype(dt)
    vh = jnp.transpose(vp.reshape(n, num_heads, hd), (1, 0, 2)).astype(dt)

    # --- per-batch scores (scale already folded into qw/qb) ----------------------
    s = jnp.einsum('hnd,hmd->hnm', qh, kh,
                   preferred_element_type=f32)          # (H, N, N)

    # --- exact softmax in f32 (fixes prior approx-reciprocal mismatch) ----------
    s = s - jnp.max(s, axis=-1, keepdims=True)
    p = jnp.exp(s)
    p = p / jnp.sum(p, axis=-1, keepdims=True)

    # --- P @ V per head ----------------------------------------------------------
    oh = jnp.einsum('hnm,hmd->hnd', p.astype(dt), vh,
                    preferred_element_type=f32)         # (H, N, hd)

    # --- merge heads and run ONE output-projection matmul ------------------------
    om = jnp.transpose(oh, (1, 0, 2)).reshape(n, dk).astype(dt)     # (N, Dk)
    out = jnp.dot(om, pw_ref[...], preferred_element_type=f32) + pb_ref[...]
    o_ref[...] = out.astype(o_ref.dtype)


def cross_attention(q, k, params, *, num_heads):
    """q: (B, N, q_dim), k: (B, N, k_dim) -> (B, N, k_dim)."""
    B, N, Dk = k.shape
    _, _, Dq = q.shape
    head_dim = Dk // num_heads
    scale = head_dim ** (-0.5)
    BN = B * N
    Dpad = ((Dk + 127) // 128) * 128            # lane-dense output width

    # ---- wrapper-side layout plumbing (constant-folded under jit in a model) ----
    q2d = q.reshape(BN, Dq)                     # fold (B, N) -> rows
    k2d = k.reshape(BN, Dk)

    # fold the attention scale into the q projection (no VPU pass over scores)
    qw = params["q_w"] * jnp.asarray(scale, params["q_w"].dtype)
    qb = params["q_b"] * jnp.asarray(scale, params["q_b"].dtype)

    kvw = params["kv_w"]
    kw, vw = kvw[:, :Dk], kvw[:, Dk:]           # split fused kv projection

    pw, pb = params["proj_w"], params["proj_b"]
    if Dpad != Dk:                              # zero-pad out-proj to 128-lane multiple
        pw = jnp.pad(pw, ((0, 0), (0, Dpad - Dk)))
        pb = jnp.pad(pb, ((0, 0), (0, Dpad - Dk)))

    kernel = functools.partial(_cross_attn_kernel, num_heads=num_heads)

    # weights: full-array, resident in VMEM (no per-step DMA / double-buffering)
    resident = pl.BlockSpec(memory_space=pltpu.MemorySpace.VMEM)

    out = pl.pallas_call(
        kernel,
        out_shape=jax.ShapeDtypeStruct((BN, Dpad), q.dtype),
        grid=(B,),
        in_specs=[
            pl.BlockSpec((N, Dq), lambda b: (b, 0)),    # q tile of this batch
            pl.BlockSpec((N, Dk), lambda b: (b, 0)),    # k tile of this batch
            resident, resident, resident, resident, resident, resident,
        ],
        out_specs=pl.BlockSpec((N, Dpad), lambda b: (b, 0)),
        compiler_params=pltpu.CompilerParams(
            dimension_semantics=("parallel",)),
    )(q2d, k2d, qw, qb, kw, vw, pw, pb)

    return out[:, :Dk].reshape(B, N, Dk)


def init_params(key, q_dim, k_dim):
    """Deterministic synthetic parameters (shapes match the nn.Module)."""
    ks = jax.random.split(key, 5)

    def lin(k_, fan_in, shape):
        bound = 1.0 / math.sqrt(fan_in)
        return jax.random.uniform(k_, shape, jnp.float32, -bound, bound)

    return {
        # nn.Linear(k_dim, 2*k_dim, bias=False) -> stored as (in, out)
        "kv_w": lin(ks[0], k_dim, (k_dim, 2 * k_dim)),
        # nn.Linear(q_dim, k_dim) with bias
        "q_w": lin(ks[1], q_dim, (q_dim, k_dim)),
        "q_b": lin(ks[2], q_dim, (1, k_dim)),
        # nn.Linear(k_dim, k_dim) with bias
        "proj_w": lin(ks[3], k_dim, (k_dim, k_dim)),
        "proj_b": lin(ks[4], k_dim, (1, k_dim)),
    }


def cross_attention_ref(q, k, params, *, num_heads):
    """Pure-JAX reference mirroring the PyTorch forward (eval mode)."""
    B, N, K = k.shape
    hd = K // num_heads
    scale = hd ** (-0.5)
    kv = k @ params["kv_w"]                                   # (B, N, 2K)
    kv = kv.reshape(B, N, 2, num_heads, hd).transpose(2, 0, 3, 1, 4)
    kk, vv = kv[0], kv[1]                                     # (B, H, N, hd)
    qq = (q @ params["q_w"] + params["q_b"]).reshape(B, N, num_heads, hd)
    qq = qq.transpose(0, 2, 1, 3)                             # (B, H, N, hd)
    attn = (qq @ kk.transpose(0, 1, 3, 2)) * scale
    attn = jax.nn.softmax(attn, axis=-1)
    out = (attn @ vv).transpose(0, 2, 1, 3).reshape(B, N, K)
    return out @ params["proj_w"] + params["proj_b"]


if __name__ == "__main__":
    B, N = 2, 8
    q_dim, k_dim, num_heads = 32, 32, 4   # head_dim = 8

    key = jax.random.PRNGKey(0)
    kq, kk_, kp = jax.random.split(key, 3)
    q = jax.random.normal(kq, (B, N, q_dim), jnp.float32)
    k = jax.random.normal(kk_, (B, N, k_dim), jnp.float32)
    params = init_params(kp, q_dim, k_dim)

    # float32 path
    out = jax.block_until_ready(cross_attention(q, k, params, num_heads=num_heads))
    ref = cross_attention_ref(q, k, params, num_heads=num_heads)
    assert out.shape == (B, N, k_dim)
    assert jnp.allclose(out, ref, atol=1e-3, rtol=1e-3), "f32 mismatch vs reference"

    # bf16 path: operands feed the MXU directly (no f32 upcast); softmax stays f32.
    q16 = q.astype(jnp.bfloat16)
    k16 = k.astype(jnp.bfloat16)
    p16 = jax.tree_util.tree_map(lambda a: a.astype(jnp.bfloat16), params)
    out16 = jax.block_until_ready(cross_attention(q16, k16, p16, num_heads=num_heads))
    ref16 = cross_attention_ref(
        q16.astype(jnp.float32), k16.astype(jnp.float32),
        jax.tree_util.tree_map(lambda a: a.astype(jnp.float32), p16),
        num_heads=num_heads)
    assert out16.shape == (B, N, k_dim)
    assert jnp.allclose(out16.astype(jnp.float32), ref16, atol=5e-2, rtol=5e-2), \
        "bf16 mismatch vs reference"

    print("KERNEL_OK")
</pallas_src>

<mosaic_0001>
module attributes {stable_mosaic.version = 11 : i64} {
  func.func @_cross_attn_kernel(%arg0: i32, %arg1: memref<8x32xf32, #tpu.memory_space<vmem>>, %arg2: memref<8x32xf32, #tpu.memory_space<vmem>>, %arg3: memref<32x32xf32, #tpu.memory_space<vmem>>, %arg4: memref<1x32xf32, #tpu.memory_space<vmem>>, %arg5: memref<32x32xf32, #tpu.memory_space<vmem>>, %arg6: memref<32x32xf32, #tpu.memory_space<vmem>>, %arg7: memref<32x128xf32, #tpu.memory_space<vmem>>, %arg8: memref<1x128xf32, #tpu.memory_space<vmem>>, %arg9: memref<8x128xf32, #tpu.memory_space<vmem>>) attributes {dimension_semantics = [#tpu.dimension_semantics<parallel>], iteration_bounds = array<i64: 2>, scalar_prefetch = 0 : i64, scratch_operands = 0 : i64, tpu.core_type = #tpu.core_type<tc>, window_params = [{transform_indices = @transform_0, window_bounds = array<i64: 8, 32>}, {transform_indices = @transform_1, window_bounds = array<i64: 8, 32>}, {pipeline_mode = #tpu.pipeline_mode<synchronous>, transform_indices = @transform_2, window_bounds = array<i64: 32, 32>}, {pipeline_mode = #tpu.pipeline_mode<synchronous>, transform_indices = @transform_3, window_bounds = array<i64: 1, 32>}, {pipeline_mode = #tpu.pipeline_mode<synchronous>, transform_indices = @transform_4, window_bounds = array<i64: 32, 32>}, {pipeline_mode = #tpu.pipeline_mode<synchronous>, transform_indices = @transform_5, window_bounds = array<i64: 32, 32>}, {pipeline_mode = #tpu.pipeline_mode<synchronous>, transform_indices = @transform_6, window_bounds = array<i64: 32, 128>}, {pipeline_mode = #tpu.pipeline_mode<synchronous>, transform_indices = @transform_7, window_bounds = array<i64: 1, 128>}, {transform_indices = @transform_8, window_bounds = array<i64: 8, 128>}]} {
    %c0 = arith.constant 0 : index
    %c0_0 = arith.constant 0 : index
    %0 = vector.load %arg1[%c0, %c0_0] : memref<8x32xf32, #tpu.memory_space<vmem>>, vector<8x32xf32>
    %c0_1 = arith.constant 0 : index
    %c0_2 = arith.constant 0 : index
    %1 = vector.load %arg2[%c0_1, %c0_2] : memref<8x32xf32, #tpu.memory_space<vmem>>, vector<8x32xf32>
    %c0_3 = arith.constant 0 : index
    %c0_4 = arith.constant 0 : index
    %2 = vector.load %arg3[%c0_3, %c0_4] : memref<32x32xf32, #tpu.memory_space<vmem>>, vector<32x32xf32>
    %cst = arith.constant dense<0.000000e+00> : vector<8x32xf32>
    %3 = tpu.matmul %0, %2, %cst {dimension_numbers = #tpu.dot_dimension_numbers<[1], [0], [0], [1], [0, 0, 1, 1], [], []>} : vector<8x32xf32>, vector<32x32xf32>, vector<8x32xf32> -> vector<8x32xf32>
    %c0_5 = arith.constant 0 : index
    %c0_6 = arith.constant 0 : index
    %4 = vector.load %arg4[%c0_5, %c0_6] : memref<1x32xf32, #tpu.memory_space<vmem>>, vector<1x32xf32>
    %5 = vector.broadcast %4 : vector<1x32xf32> to vector<8x32xf32>
    %6 = arith.addf %3, %5 : vector<8x32xf32>
    %c0_7 = arith.constant 0 : index
    %c0_8 = arith.constant 0 : index
    %7 = vector.load %arg5[%c0_7, %c0_8] : memref<32x32xf32, #tpu.memory_space<vmem>>, vector<32x32xf32>
    %cst_9 = arith.constant dense<0.000000e+00> : vector<8x32xf32>
    %8 = tpu.matmul %1, %7, %cst_9 {dimension_numbers = #tpu.dot_dimension_numbers<[1], [0], [0], [1], [0, 0, 1, 1], [], []>} : vector<8x32xf32>, vector<32x32xf32>, vector<8x32xf32> -> vector<8x32xf32>
    %c0_10 = arith.constant 0 : index
    %c0_11 = arith.constant 0 : index
    %9 = vector.load %arg6[%c0_10, %c0_11] : memref<32x32xf32, #tpu.memory_space<vmem>>, vector<32x32xf32>
    %cst_12 = arith.constant dense<0.000000e+00> : vector<8x32xf32>
    %10 = tpu.matmul %1, %9, %cst_12 {dimension_numbers = #tpu.dot_dimension_numbers<[1], [0], [0], [1], [0, 0, 1, 1], [], []>} : vector<8x32xf32>, vector<32x32xf32>, vector<8x32xf32> -> vector<8x32xf32>
    %11 = vector.shape_cast %6 : vector<8x32xf32> to vector<8x4x8xf32>
    %12 = tpu.transpose %11, [1, 0, 2] : vector<8x4x8xf32> -> vector<4x8x8xf32>
    %13 = vector.shape_cast %8 : vector<8x32xf32> to vector<8x4x8xf32>
    %14 = tpu.transpose %13, [1, 0, 2] : vector<8x4x8xf32> -> vector<4x8x8xf32>
    %15 = vector.shape_cast %10 : vector<8x32xf32> to vector<8x4x8xf32>
    %16 = tpu.transpose %15, [1, 0, 2] : vector<8x4x8xf32> -> vector<4x8x8xf32>
    "tpu.trace_start"() <{level = 10 : i32, message = "hnd,hmd->hnm"}> : () -> ()
    %cst_13 = arith.constant dense<0.000000e+00> : vector<4x8x8xf32>
    %17 = tpu.matmul %12, %14, %cst_13 {dimension_numbers = #tpu.dot_dimension_numbers<[2], [2], [1], [1], [0, 0, 0, 1, 1, 1], [0], [0]>} : vector<4x8x8xf32>, vector<4x8x8xf32>, vector<4x8x8xf32> -> vector<4x8x8xf32>
    "tpu.trace_stop"() : () -> ()
    %cst_14 = arith.constant dense<0xFF800000> : vector<4x8xf32>
    %18 = vector.multi_reduction <maximumf>, %17, %cst_14 [2] : vector<4x8x8xf32> to vector<4x8xf32>
    %19 = vector.shape_cast %18 : vector<4x8xf32> to vector<4x8x1xf32>
    %20 = vector.broadcast %19 : vector<4x8x1xf32> to vector<4x8x8xf32>
    %21 = arith.subf %17, %20 : vector<4x8x8xf32>
    %22 = math.exp %21 : vector<4x8x8xf32>
    %cst_15 = arith.constant dense<0.000000e+00> : vector<4x8xf32>
    %23 = vector.multi_reduction <add>, %22, %cst_15 [2] : vector<4x8x8xf32> to vector<4x8xf32>
    %24 = vector.shape_cast %23 : vector<4x8xf32> to vector<4x8x1xf32>
    %25 = vector.broadcast %24 : vector<4x8x1xf32> to vector<4x8x8xf32>
    %26 = arith.divf %22, %25 : vector<4x8x8xf32>
    "tpu.trace_start"() <{level = 10 : i32, message = "hnm,hmd->hnd"}> : () -> ()
    %cst_16 = arith.constant dense<0.000000e+00> : vector<4x8x8xf32>
    %27 = tpu.matmul %26, %16, %cst_16 {dimension_numbers = #tpu.dot_dimension_numbers<[2], [1], [1], [2], [0, 0, 0, 1, 1, 2], [0], [0]>} : vector<4x8x8xf32>, vector<4x8x8xf32>, vector<4x8x8xf32> -> vector<4x8x8xf32>
    "tpu.trace_stop"() : () -> ()
    %28 = tpu.transpose %27, [1, 0, 2] : vector<4x8x8xf32> -> vector<8x4x8xf32>
    %29 = vector.shape_cast %28 : vector<8x4x8xf32> to vector<8x32xf32>
    %c0_17 = arith.constant 0 : index
    %c0_18 = arith.constant 0 : index
    %30 = vector.load %arg7[%c0_17, %c0_18] : memref<32x128xf32, #tpu.memory_space<vmem>>, vector<32x128xf32>
    %cst_19 = arith.constant dense<0.000000e+00> : vector<8x128xf32>
    %31 = tpu.matmul %29, %30, %cst_19 {dimension_numbers = #tpu.dot_dimension_numbers<[1], [0], [0], [1], [0, 0, 1, 1], [], []>} : vector<8x32xf32>, vector<32x128xf32>, vector<8x128xf32> -> vector<8x128xf32>
    %c0_20 = arith.constant 0 : index
    %c0_21 = arith.constant 0 : index
    %32 = vector.load %arg8[%c0_20, %c0_21] : memref<1x128xf32, #tpu.memory_space<vmem>>, vector<1x128xf32>
    %33 = vector.broadcast %32 : vector<1x128xf32> to vector<8x128xf32>
    %34 = arith.addf %31, %33 : vector<8x128xf32>
    %c0_22 = arith.constant 0 : index
    %c0_23 = arith.constant 0 : index
    %35 = vector.load %arg9[%c0_22, %c0_23] : memref<8x128xf32, #tpu.memory_space<vmem>>, vector<8x128xf32>
    tpu.vector_store %arg9[%c0_22, %c0_23], %34 {strides = array<i32>} : memref<8x128xf32, #tpu.memory_space<vmem>>, vector<8x128xf32>,
    return
  }
  func.func @transform_0(%arg0: i32) -> (i32, i32) {
    %c0_i32 = arith.constant 0 : i32
    %c0_i32_0 = arith.constant 0 : i32
    return %arg0, %c0_i32 : i32, i32
  }
  func.func @transform_1(%arg0: i32) -> (i32, i32) {
    %c0_i32 = arith.constant 0 : i32
    %c0_i32_0 = arith.constant 0 : i32
    return %arg0, %c0_i32 : i32, i32
  }
  func.func @transform_2(%arg0: i32) -> (i32, i32) {
    %c0_i32 = arith.constant 0 : i32
    %c0_i32_0 = arith.constant 0 : i32
    %c0_i32_1 = arith.constant 0 : i32
    return %c0_i32, %c0_i32_0 : i32, i32
  }
  func.func @transform_3(%arg0: i32) -> (i32, i32) {
    %c0_i32 = arith.constant 0 : i32
    %c0_i32_0 = arith.constant 0 : i32
    %c0_i32_1 = arith.constant 0 : i32
    return %c0_i32, %c0_i32_0 : i32, i32
  }
  func.func @transform_4(%arg0: i32) -> (i32, i32) {
    %c0_i32 = arith.constant 0 : i32
    %c0_i32_0 = arith.constant 0 : i32
    %c0_i32_1 = arith.constant 0 : i32
    return %c0_i32, %c0_i32_0 : i32, i32
  }
  func.func @transform_5(%arg0: i32) -> (i32, i32) {
    %c0_i32 = arith.constant 0 : i32
    %c0_i32_0 = arith.constant 0 : i32
    %c0_i32_1 = arith.constant 0 : i32
    return %c0_i32, %c0_i32_0 : i32, i32
  }
  func.func @transform_6(%arg0: i32) -> (i32, i32) {
    %c0_i32 = arith.constant 0 : i32
    %c0_i32_0 = arith.constant 0 : i32
    %c0_i32_1 = arith.constant 0 : i32
    return %c0_i32, %c0_i32_0 : i32, i32
  }
  func.func @transform_7(%arg0: i32) -> (i32, i32) {
    %c0_i32 = arith.constant 0 : i32
    %c0_i32_0 = arith.constant 0 : i32
    %c0_i32_1 = arith.constant 0 : i32
    return %c0_i32, %c0_i32_0 : i32, i32
  }
  func.func @transform_8(%arg0: i32) -> (i32, i32) {
    %c0_i32 = arith.constant 0 : i32
    %c0_i32_0 = arith.constant 0 : i32
    return %arg0, %c0_i32 : i32, i32
  }
}

</mosaic_0001>

<bundles_post_ra>
// kernel: tpu_custom_call.1
= control target key start
LH: loop header
LB: loop body
LE: loop exit
PB: predicated region body
PF: predicated region fallthrough
CT: control target
= control target key end

     0   :  { %s3259_s0 = inlined_call_operand.hbm [shape: f32[16,32], index: 0, kind: input, shape index: {}]   ;;  %s3260_s1 = inlined_call_operand.hbm [shape: f32[16,32], index: 1, kind: input, shape index: {}]   ;;  %s3261_s2 = inlined_call_operand.hbm [shape: f32[32,32], index: 2, kind: input, shape index: {}]   ;;  %s3262_s3 = inlined_call_operand.vmem [shape: f32[1,32], index: 3, kind: input, shape index: {}]   ;;  %s3263_s4 = inlined_call_operand.hbm [shape: f32[32,32], index: 4, kind: input, shape index: {}]   ;;  %s3264_s5 = inlined_call_operand.hbm [shape: f32[32,32], index: 5, kind: input, shape index: {}]   ;;  %s3265_s6 = inlined_call_operand.hbm [shape: f32[32,128], index: 6, kind: input, shape index: {}]   ;;  %s3266_s7 = inlined_call_operand.vmem [shape: f32[1,128], index: 7, kind: input, shape index: {}]   ;;  %s3267_s8 = inlined_call_operand.hbm [shape: f32[16,128], index: 8, kind: output, shape index: {}]  }
   0x1   :  { %3272 = sst [smem:[#allocation21_spill]] %s3261_s2 }
   0x2   :  { %3273 = sst [smem:[#allocation22_spill]] %s3263_s4 }
   0x3   :  { %3274 = sst [smem:[#allocation23_spill]] %s3264_s5 }
   0x4   :  { %3275 = sst [smem:[#allocation24_spill]] %s3265_s6 }
   0x5   :  { %13 = vsyncpa [#allocation3], 0 }
   0x6   :  { %15 = vsyncpa [#allocation3 + $0x1], 0 }
   0x7   :  { %16 = vsyncpa [#allocation6], 0 }
   0x8   :  { %18 = vsyncpa [#allocation6 + $0x1], 0 }
   0x9   :  { %19 = vsyncpa [#allocation9], 0 }
   0xa   :  { %20 = vsyncpa [#allocation12], 0 }
   0xb   :  { %21 = vsyncpa [#allocation4], 0 }
   0xc   :  { %23 = vsyncpa [#allocation4 + $0x1], 0  ;;  %s2751_s27 = smov 0   ;;  %s2753_s28 = smov 0  }
   0xd   :  { %s2755_s29 = smov 0   ;;  %s2757_s30 = smov 0  }
   0xe LB: > { %s2686_s9 = smov [#allocation7]   ;;  %s2772_s11 = sadd.s32 4294967295, %s2684_s30   ;;  %s2684_s30 = sphi %s2757_s30, %s3305_s30   ;;  %s2680_s29 = sphi %s2755_s29, %s3304_s29   ;;  %s2676_s28 = sphi %s2753_s28, %s3303_s28   ;;  %s2672_s27 = sphi %s2751_s27, %s3302_s27  }
   0xf   : > { %s250_s10 = sshll.u32 %s2686_s9, 4  ;;  %p2117_p0 = scmp.ge.s32.totalorder %s2684_s30, 1  ;;  %s2777_s10 = int_to_ptr.vmem [resolvable:$true] %s250_s10 }
  0x10   : > { %p3268_p1 = scmp.eq.s32.totalorder %s2772_s11, 0  ;;  %p238_p2 = scmp.lt.s32.totalorder %s2684_s30, 3 }
  0x11   : > { %s2687_s13 = smov [#allocation8]   ;;  %s2688_s16 = smov [#allocation10]  }
  0x12   : > { %p2779_p3 = pnand %p2117_p0, %p238_p2  ;;  %s266_s14 = sshll.u32 %s2687_s13, 4  ;;  %s2792_s14 = int_to_ptr.vmem [resolvable:$true] %s266_s14 }
  0x13   : > { %s279_s17 = sshll.u32 %s2688_s16, 4  ;;  %s3278_s2 = sld [smem:[#allocation21_spill]]  ;;  %s2794_s17 = int_to_ptr.vmem [resolvable:$true] %s279_s17 }
  0x14   : > { %s3276_s12 = scalar_select %p2779_p3, 1, 0 }
  0x15   : > { %p2331_p5 = pneg %p2779_p3 }
  0x17   : > { %p2788_p6 = pnand %p2331_p5, %p3268_p1 }
  0x19   : > { %s2430_s20 = scalar_lea.hbm %s3278_s2, 512  ;;  %p2804_p8 = pneg %p2788_p6 }
  0x1a   : > { %p2431_p7 = scmp.ne.s32.totalorder %s3278_s2, %s2430_s20  ;;  %p2437_p11 = scmp.lt.u32.totalorder %s2430_s20, %s3278_s2 }
  0x1c   : > { %p2433_p9 = pnand %p2804_p8, %p2431_p7 }
  0x1e   : > { %p2434_p10 = pneg %p2433_p9 }
  0x20   : > { %p2439_p12 = pnand %p2437_p11, %p2434_p10 }
  0x22   : > { %2442 = shalt.err (!%p2439_p12)
}
  0x23   : > { %s2443_s26 = scalar_lea.vmem %s2777_s10, 512  ;;  %p2451_p5 = scmp.lt.s32.totalorder %s2777_s10, %s2777_s10 }
  0x24   : > { %p2444_p13 = scmp.ne.s32.totalorder %s2777_s10, %s2443_s26  ;;  %p2452_p4 = scmp.lt.s32.totalorder %s2443_s26, %s2443_s26 }
  0x26   : > { %p2446_p0 = pnand %p2444_p13, %p2804_p8  ;;  %p2453_p7 = por %p2452_p4, %p2451_p5 }
  0x28   : > { %p2447_p2 = pneg %p2446_p0 }
  0x2a   : > { %p2454_p9 = pnand %p2453_p7, %p2447_p2 }
  0x2c   : > { %2457 = shalt.err (!%p2454_p9)
}
  0x2d   : > { %s2689_s9 = smov 128   ;;  %s2690_s13 = smov 8  }
  0x2e   : > { %2334 = dma.hbm_to_vmem [thread:$0]  (!%p2788_p6), %s3278_s2, 512, %s2777_s10, [#allocation6], %s2689_s9, %s2689_s9, %s2690_s13  }
  0x2f   : > { %s3280_s4 = sld [smem:[#allocation22_spill]] }
  0x35   : > { %s2458_s21 = scalar_lea.hbm %s3280_s4, 512 }
  0x36   : > { %p2459_p4 = scmp.ne.s32.totalorder %s3280_s4, %s2458_s21  ;;  %p2465_p12 = scmp.lt.u32.totalorder %s2458_s21, %s3280_s4 }
  0x38   : > { %p2461_p10 = pnand %p2459_p4, %p2804_p8 }
  0x3a   : > { %p2462_p11 = pneg %p2461_p10 }
  0x3c   : > { %p2467_p13 = pnand %p2465_p12, %p2462_p11 }
  0x3e   : > { %2470 = shalt.err (!%p2467_p13)
}
  0x3f   : > { %s2471_s10 = scalar_lea.vmem %s2792_s14, 512  ;;  %p2479_p7 = scmp.lt.s32.totalorder %s2792_s14, %s2792_s14 }
  0x40   : > { %p2472_p0 = scmp.ne.s32.totalorder %s2792_s14, %s2471_s10  ;;  %p2480_p9 = scmp.lt.s32.totalorder %s2471_s10, %s2471_s10 }
  0x42   : > { %p2474_p2 = pnand %p2472_p0, %p2804_p8  ;;  %p2481_p4 = por %p2480_p9, %p2479_p7 }
  0x44   : > { %p2475_p5 = pneg %p2474_p2 }
  0x46   : > { %p2482_p10 = pnand %p2481_p4, %p2475_p5 }
  0x48   : > { %2485 = shalt.err (!%p2482_p10)
}
  0x49   : > { %2337 = dma.hbm_to_vmem [thread:$0]  (!%p2788_p6), %s3280_s4, 512, %s2792_s14, [#allocation9], %s2689_s9, %s2689_s9, %s2690_s13  }
  0x4a   : > { %s3281_s5 = sld [smem:[#allocation23_spill]] }
  0x50   : > { %s2486_s21 = scalar_lea.hbm %s3281_s5, 512 }
  0x51   : > { %p2487_p11 = scmp.ne.s32.totalorder %s3281_s5, %s2486_s21  ;;  %p2493_p0 = scmp.lt.u32.totalorder %s2486_s21, %s3281_s5 }
  0x53   : > { %p2489_p12 = pnand %p2487_p11, %p2804_p8 }
  0x55   : > { %p2490_p13 = pneg %p2489_p12 }
  0x57   : > { %p2495_p2 = pnand %p2493_p0, %p2490_p13 }
  0x59   : > { %2498 = shalt.err (!%p2495_p2)
}
  0x5a   : > { %s2499_s14 = scalar_lea.vmem %s2794_s17, 512  ;;  %p2507_p4 = scmp.lt.s32.totalorder %s2794_s17, %s2794_s17 }
  0x5b   : > { %p2500_p5 = scmp.ne.s32.totalorder %s2794_s17, %s2499_s14  ;;  %p2508_p10 = scmp.lt.s32.totalorder %s2499_s14, %s2499_s14 }
  0x5d   : > { %p2502_p7 = pnand %p2500_p5, %p2804_p8  ;;  %p2509_p11 = por %p2508_p10, %p2507_p4 }
  0x5f   : > { %p2503_p9 = pneg %p2502_p7 }
  0x61   : > { %p2510_p12 = pnand %p2509_p11, %p2503_p9 }
  0x63   : > { %2513 = shalt.err (!%p2510_p12)
}
  0x64   : > { %2340 = dma.hbm_to_vmem [thread:$0]  (!%p2788_p6), %s3281_s5, 512, %s2794_s17, [#allocation9], %s2689_s9, %s2689_s9, %s2690_s13  }
  0x65   : > { %s2691_s18 = smov [#allocation11]   ;;  %s3282_s6 = sld [smem:[#allocation24_spill]] }
  0x66   : > { %s292_s19 = sshll.u32 %s2691_s18, 4  ;;  %s293_s19 = int_to_ptr.vmem [resolvable:$true] %s292_s19 }
  0x6b   : > { %s2514_s22 = scalar_lea.hbm %s3282_s6, 512 }
  0x6c   : > { %p2515_p13 = scmp.ne.s32.totalorder %s3282_s6, %s2514_s22  ;;  %p2521_p5 = scmp.lt.u32.totalorder %s2514_s22, %s3282_s6 }
  0x6e   : > { %p2517_p0 = pnand %p2515_p13, %p2804_p8 }
  0x70   : > { %p2518_p2 = pneg %p2517_p0 }
  0x72   : > { %p2523_p7 = pnand %p2521_p5, %p2518_p2 }
  0x74   : > { %2526 = shalt.err (!%p2523_p7)
}
  0x75   : > { %s2527_s17 = scalar_lea.vmem %s293_s19, 512  ;;  %p2535_p11 = scmp.lt.s32.totalorder %s293_s19, %s293_s19 }
  0x76   : > { %p2528_p9 = scmp.ne.s32.totalorder %s293_s19, %s2527_s17  ;;  %p2536_p12 = scmp.lt.s32.totalorder %s2527_s17, %s2527_s17 }
  0x78   : > { %p2530_p4 = pnand %p2528_p9, %p2804_p8  ;;  %p2537_p1 = por %p2536_p12, %p2535_p11 }
  0x7a   : > { %p2531_p10 = pneg %p2530_p4 }
  0x7c   : > { %p2538_p3 = pnand %p2537_p1, %p2531_p10 }
  0x7e   : > { %2541 = shalt.err (!%p2538_p3)
}
  0x7f   : > { %2343 = dma.hbm_to_vmem [thread:$0]  (!%p2788_p6), %s3282_s6, 512, %s293_s19, [#allocation12], %s2689_s9, %s2689_s9, %s2690_s13  }
  0x80   : > { %s2116_s15 = sadd.s32 4294967294, %s2684_s30   ;;  %s2903_s23 = sadd.s32 1, %s2684_s30  }
  0x81   : > { %s33_s18 = ssub.s32 %s2684_s30, %s2903_s23  ;;  %s36_s20 = sadd.s32 1, %s2680_s29 }
  0x82   : > { %p34_p1 = scmp.eq.s32.totalorder %s33_s18, 0  ;;  %p43_p3 = scmp.ne.s32.totalorder %s2680_s29, %s2676_s28 }
  0x83   : > { %p44_p8 = scmp.eq.s32.totalorder %s2684_s30, 0  ;;  %p49_p13 = scmp.ne.s32.totalorder %s2676_s28, %s2672_s27 }
  0x84   : > { %s2914_s21 = scalar_select %p34_p1, %s2680_s29, %s36_s20  }
  0x85   : > { %p2916_p0 = por %p44_p8, %p43_p3  ;;  %p3285_p2 = scmp.eq.s32.totalorder %s2772_s11, 0 }
  0x86   : > { %3283 = sst [smem:[#allocation20_spill]] %s2914_s21  ;;  %p225_p5 = scmp.eq.s32.totalorder %s2772_s11, 1 }
  0x87   : > { %p2922_p6 = por %p3285_p2, %p49_p13  ;;  %p231_p7 = scmp.eq.s32.totalorder %s2116_s15, 1 }
  0x88   : > { %p2359_p9 = scmp.lt.s32.totalorder %s2684_s30, 2  ;;  %s309_s13 = sand.u32 1, %s2680_s29  }
  0x89   : > { %s3286_s9 = scalar_select %p2922_p6, 1, 0 }
  0x8a   : > { %p2929_p4 = por %p225_p5, %p43_p3  ;;  %p2933_p10 = por %p231_p7, %p49_p13 }
  0x8b   : > { %s2937_s25 = sshll.u32 %s309_s13, 3  ;;  %s2124_s26 = sshll.u32 %s2684_s30, 7 }
  0x8c   : > { %s3287_s19 = scalar_select %p2929_p4, 1, 0 }
  0x8d   : > { %s3288_s24 = scalar_select %p2933_p10, 1, 0 }
  0x8e   : > { %s2943_s10 = scalar_lea.hbm %s3259_s0, %s2124_s26  ;;  %s313_s16 = scalar_lea.vmem [#allocation2], %s2937_s25 }
  0x8f   : > { %s320_s15 = sshll.u32 %s313_s16, 4  ;;  %p2950_p11 = pnand %p2359_p9, %p2916_p0  ;;  %s2946_s15 = int_to_ptr.vmem [resolvable:$true] %s320_s15 }
  0x90   : > { %s2957_s14 = scalar_lea.hbm %s3260_s1, %s2124_s26  ;;  %s327_s17 = sand.u32 1, %s2684_s30  }
  0x91   : > { %s310_s4 = scalar_lea.sflag [#allocation3], %s309_s13  ;;  %s2542_s5 = scalar_lea.hbm %s2943_s10, 128 }
  0x92   : > { %p2543_p12 = scmp.ne.s32.totalorder %s2943_s10, %s2542_s5  ;;  %p2544_p1 = pneg %p2950_p11 }
  0x93   : > { %s2547_s6 = scalar_lea.hbm %s3259_s0, 256  ;;  %p2548_p13 = scmp.lt.u32.totalorder %s2943_s10, %s3259_s0 }
  0x94   : > { %p2545_p3 = pnand %p2544_p1, %p2543_p12  ;;  %p2549_p0 = scmp.lt.u32.totalorder %s2547_s6, %s2542_s5 }
  0x95   : > { %p2551_p5 = scmp.lt.u32.totalorder %s2542_s5, %s2943_s10 }
  0x96   : > { %p2546_p8 = pneg %p2545_p3  ;;  %p2550_p2 = por %p2549_p0, %p2548_p13 }
  0x98   : > { %p2552_p7 = por %p2551_p5, %p2550_p2 }
  0x9a   : > { %p2553_p9 = pnand %p2552_p7, %p2546_p8 }
  0x9c   : > { %2556 = shalt.err (!%p2553_p9)
}
  0x9d   : > { %s2557_s13 = scalar_lea.vmem %s2946_s15, 128  ;;  %s2692_s26 = smov [#allocation2]  }
  0x9e   : > { %p2558_p12 = scmp.ne.s32.totalorder %s2946_s15, %s2557_s13  ;;  %s2562_s20 = sshll.u32 %s2692_s26, 4  ;;  %s2563_s20 = int_to_ptr.vmem [resolvable:$false] %s2562_s20 }
  0x9f   : > { %s2564_s21 = scalar_lea.vmem %s2563_s20, 256  ;;  %p2565_p4 = scmp.lt.s32.totalorder %s2946_s15, %s2563_s20 }
  0xa0   : > { %p2560_p3 = pnand %p2558_p12, %p2544_p1  ;;  %p2566_p13 = scmp.lt.s32.totalorder %s2564_s21, %s2557_s13 }
  0xa2   : > { %p2561_p10 = pneg %p2560_p3  ;;  %p2567_p0 = por %p2566_p13, %p2565_p4 }
  0xa4   : > { %p2568_p2 = pnand %p2567_p0, %p2561_p10 }
  0xa6   : > { %2571 = shalt.err (!%p2568_p2)
}
  0xa7   : > { %2347 = dma.hbm_to_vmem [thread:$0]  (!%p2950_p11), %s2943_s10, 128, %s2946_s15, %s310_s4  }
  0xa8   : > { %s331_s5 = scalar_lea.vmem [#allocation5], %s2937_s25  ;;  %s328_s22 = scalar_lea.sflag [#allocation6], %s327_s17 }
  0xa9   : > { %s338_s6 = sshll.u32 %s331_s5, 4  ;;  %s2572_s16 = scalar_lea.hbm %s2957_s14, 128  ;;  %s339_s6 = int_to_ptr.vmem [resolvable:$true] %s338_s6 }
  0xaa   : > { %p2573_p4 = scmp.ne.s32.totalorder %s2957_s14, %s2572_s16  ;;  %s2577_s26 = scalar_lea.hbm %s3260_s1, 256 }
  0xab   : > { %p2578_p5 = scmp.lt.u32.totalorder %s2957_s14, %s3260_s1  ;;  %p2579_p7 = scmp.lt.u32.totalorder %s2577_s26, %s2572_s16 }
  0xac   : > { %p2575_p10 = pnand %p2573_p4, %p2544_p1  ;;  %p2581_p12 = scmp.lt.u32.totalorder %s2572_s16, %s2957_s14 }
  0xad   : > { %p2580_p9 = por %p2579_p7, %p2578_p5 }
  0xae   : > { %p2576_p8 = pneg %p2575_p10 }
  0xaf   : > { %p2582_p3 = por %p2581_p12, %p2580_p9 }
  0xb1   : > { %p2583_p13 = pnand %p2582_p3, %p2576_p8 }
  0xb3   : > { %2586 = shalt.err (!%p2583_p13)
}
  0xb4   : > { %s2587_s4 = scalar_lea.vmem %s339_s6, 128  ;;  %s2693_s25 = smov [#allocation5]  }
  0xb5   : > { %p2588_p0 = scmp.ne.s32.totalorder %s339_s6, %s2587_s4  ;;  %s2592_s10 = sshll.u32 %s2693_s25, 4  ;;  %s2593_s10 = int_to_ptr.vmem [resolvable:$false] %s2592_s10 }
  0xb6   : > { %s2594_s15 = scalar_lea.vmem %s2593_s10, 256  ;;  %p2595_p10 = scmp.lt.s32.totalorder %s339_s6, %s2593_s10 }
  0xb7   : > { %p2590_p2 = pnand %p2588_p0, %p2544_p1  ;;  %p2596_p6 = scmp.lt.s32.totalorder %s2594_s15, %s2587_s4 }
  0xb9   : > { %p2591_p4 = pneg %p2590_p2  ;;  %p2597_p5 = por %p2596_p6, %p2595_p10 }
  0xbb   : > { %p2598_p7 = pnand %p2597_p5, %p2591_p4 }
  0xbd   : > { %2601 = shalt.err (!%p2598_p7)
}
  0xbe   : > { %2350 = dma.hbm_to_vmem [thread:$0]  (!%p2950_p11), %s2957_s14, 128, %s339_s6, %s328_s22  }
  0xbf   : > { %p3290_p8 = scmp.ne.s32.totalorder %s3276_s12, 0 }
  0xc0   : > { %s3010_s17 = sand.u32 (!%p3290_p8), 1, %s2676_s28   ;;  %p3291_p6 = scmp.ne.s32.totalorder (!%p3290_p8), %s3286_s9, 0 }
  0xc1   : > { %347 = sbr.rel (%p3290_p8) target bundleno = 1709 (0x6ad), region = 52  ;;  %s3013_s5 = sshll.u32 (!%p3290_p8), %s3010_s17, 3 }
  0xc2   : > { %s350_s16 = scalar_lea.sflag (!%p3290_p8), [#allocation3], %s3010_s17  ;;  %s353_s2 = scalar_lea.vmem (!%p3290_p8), [#allocation2], %s3013_s5 }
  0xc8   : > { %2647 = dma.done.wait (%p3291_p6), %s350_s16, 128  }
  0xc9   : > { %2649 = vsyncadd (%p3291_p6), %s350_s16, 4294967168  ;;  %s358_s12 = sand.u32 1, %s2772_s11   ;;  %s362_s14 = scalar_lea.vmem [#allocation5], %s3013_s5 }
  0xca   : > { %s359_s18 = scalar_lea.sflag [#allocation6], %s358_s12 }
  0xcb   : > { %2651 = dma.done.wait (%p3291_p6), %s359_s18, 128  }
  0xcc   : > { %2653 = vsyncadd (%p3291_p6), %s359_s18, 4294967168  ;;  %p3292_p11 = scmp.eq.s32.totalorder %s2772_s11, 0 }
  0xce   : > { %2655 = dma.done.wait (%p3292_p11), [#allocation6], 512   ;;  %p3293_p1 = pmov %p3292_p11 }
  0xd0   : > { %2657 = vsyncadd (%p3293_p1), [#allocation6], 4294966784  ;;  %p3294_p9 = pmov %p3293_p1 }
  0xd1   : > { %p3295_p12 = pmov %p3293_p1 }
  0xd2   : > { %2659 = dma.done.wait (%p3294_p9), [#allocation9], 1024  }
  0xd3   : > { %2661 = vsyncadd (%p3295_p12), [#allocation9], 4294966272  ;;  %p3296_p3 = pmov %p3293_p1 }
  0xd4   : > { %p3297_p13 = pmov %p3293_p1 }
  0xd5   : > { %2663 = dma.done.wait (%p3296_p3), [#allocation12], 512  }
  0xd6   : > { %2665 = vsyncadd (%p3297_p13), [#allocation12], 4294966784  ;;  %v2694_v0 = vmov 0.0|0.0   ;;  %vm2695_vm0 = vmmov 0   ;;  %v2696_v1 = vmov 0.0   ;;  %v503_v2 = vld [vmem:[#allocation8] sm:$0xff]  ;;  %v669_v30 = vlaneseq }
  0xd7   : > { %2291 = vmatprep.subr.bf16.mxu1 %v2694_v0  ;;  %2285 = vmatprep.subr.bf16.mxu0 %v2694_v0  ;;  %v504_v3 = vld [vmem:[#allocation8 + $0x8] sm:$0xff]  ;;  %v418_v4 = vld [vmem:[#allocation7] sm:$0xff]  ;;  %v505_v7 = vld [vmem:[#allocation8 + $0x10] sm:$0xff]  ;;  %vm429_vm1 = vcmask 261120   ;;  %s2697_s22 = smov 104   ;;  %s2698_s13 = smov 120  }
  0xd8   : > { %2220 = vmatprep.mubr.msk.f32.mxu1 %vm2695_vm0, %v2696_v1  ;;  %2209 = vmatprep.mubr.msk.f32.mxu0 %vm2695_vm0, %v2696_v1  ;;  %v2292_v5 = vpack.c.bf16 %v504_v3, %v503_v2  ;;  %v419_v6 = vld [vmem:[#allocation7 + $0x8] sm:$0xff]  ;;  %v506_v8 = vld [vmem:[#allocation8 + $0x18] sm:$0xff]  ;;  %v420_v10 = vld [vmem:[#allocation7 + $0x10] sm:$0xff]  ;;  %s2699_s26 = smov 112   ;;  %v2700_v28 = vmov 1983009808  }
  0xd9   : > { %v2286_v9 = vpack.c.bf16 %v419_v6, %v418_v4  ;;  %v421_v11 = vld [vmem:[#allocation7 + $0x18] sm:$0xff]  ;;  %v2295_v12 = vpack.c.bf16 %v506_v8, %v505_v7  ;;  %v416_v15 = vld [vmem:[%s353_s2] sm:$0xff]  ;;  %v582_v24 = vld [vmem:[#allocation10 + $0x10] sm:$0xff]  ;;  %v667_v29 = vunpack.c.l.s4 %v2700_v28  ;;  %v2701_v31 = vmov 1934713408   ;;  %s2702_s20 = smov 16  }
  0xda   : > { %2293 = vmatpush3.bf16.msra.mxu1 %v2292_v5  ;;  %v2289_v13 = vpack.c.bf16 %v421_v11, %v420_v10  ;;  %v417_v14 = vld [vmem:[%s362_s14] sm:$0xff]  ;;  %v2135_v16 = vld [vmem:[%s3262_s3] ss:$0 sm:$0xff]  ;;  %v581_v23 = vld [vmem:[#allocation10 + $0x8] sm:$0xff]  ;;  %v699_v32 = vunpack.c.l.s4 %v2701_v31  ;;  %v670_v34 = vshrl.u32 %v669_v30, 7  ;;  %vm1092_vm2 = vcmask 64512  }
  0xdb   : > { %2287 = vmatpush3.bf16.msra.mxu0 %v2286_v9  ;;  %2294 = vmatprep.subr.bf16.mxu1 %v2694_v0  ;;  %v580_v22 = vld [vmem:[#allocation10] sm:$0xff]  ;;  %v583_v26 = vld [vmem:[#allocation10 + $0x18] sm:$0xff]  ;;  %v668_v33 = vunpack.c.0.s8 %v667_v29  ;;  %s2703_s21 = smov 8   ;;  %s2704_s4 = smov 24   ;;  %vm1882_vm3 = vcmask 130048   ;;  %vm1884_vm4 = vcmask 195584  }
  0xdc   : > { %2288 = vmatprep.subr.bf16.mxu0 %v2694_v0  ;;  %v2298_v25 = vpack.c.bf16 %v581_v23, %v580_v22  ;;  %v2301_v27 = vpack.c.bf16 %v583_v26, %v582_v24  ;;  %v700_v37 = vunpack.c.0.s8 %v699_v32  ;;  %s2162_s15 = sshll.u32 %s2772_s11, 7  ;;  %s415_s16 = scalar_lea.vmem [#allocation13], %s3013_s5 }
  0xdd   : > { %v3073_v38 = vsub.s32 %v668_v33, %v670_v34  ;;  %s1985_s2 = sshll.u32 %s415_s16, 4  ;;  %s3215_s14 = scalar_lea.hbm %s3267_s8, %s2162_s15  ;;  %s3217_s2 = int_to_ptr.vmem [resolvable:$true] %s1985_s2 }
  0xde   : > { %2296 = vmatpush3.bf16.msra.mxu1 %v2295_v12  ;;  %v3075_v45 = vsub.s32 %v700_v37, %v670_v34  ;;  %s1972_s9 = scalar_lea.sflag [#allocation4], %s3010_s17  ;;  %s2602_s6 = scalar_lea.vmem %s3217_s2, 128 }
  0xdf   : > { %2290 = vmatpush3.bf16.msra.mxu0 %v2289_v13  ;;  %2234 = vmatprep.subr.mxu1 %v2696_v1  ;;  %p2603_p0 = scmp.ne.s32.totalorder %s3217_s2, %s2602_s6  ;;  %p3298_p2 = scmp.ne.s32.totalorder %s3287_s19, 0 }
  0xe0   : > { %2297 = vmatprep.subr.bf16.mxu0 %v2694_v0  ;;  %s2705_s11 = smov [#allocation13]  }
  0xe1   : > { %2221 = vmatmul.mubr.msk.f32.vlgmr.msra.gmra.mrb[0].mxu1 %vm429_vm1, %v417_v14  ;;  %p2604_p4 = pnand %p2603_p0, %p3298_p2  ;;  %s2606_s5 = sshll.u32 %s2705_s11, 4  ;;  %s2607_s5 = int_to_ptr.vmem [resolvable:$false] %s2606_s5 }
  0xe2   : > { %2210 = vmatmul.mubr.msk.f32.vlgmr.msra.gmra.mrb[0].mxu0 %vm429_vm1, %v416_v15  ;;  %2236 = vmatprep.mubr.msk.f32.mxu1 %vm2695_vm0, %v2696_v1  ;;  %p2609_p5 = scmp.lt.s32.totalorder %s3217_s2, %s2607_s5 }
  0xe3   : > { %2231 = vmatprep.mubr.msk.f32.mxu0 %vm2695_vm0, %v2696_v1  ;;  %2299 = vmatpush3.bf16.msra.mxu0 %v2298_v25  ;;  %p2605_p10 = pneg %p2604_p4 }
  0xe4   : > { %2300 = vmatprep.subr.bf16.mxu0 %v2694_v0 }
  0xe7   : > { %2302 = vmatpush3.bf16.msra.mxu0 %v2301_v27 }
  0xe8   : > { %2254 = vmatprep.subr.mxu0 %v2696_v1 }
  0xea   : > { %2232 = vmatmul.mubr.msk.f32.vlgmr.msra.gmra.mrb[2].mxu0 %vm429_vm1, %v417_v14 }
  0xeb   : > { %2256 = vmatprep.mubr.msk.f32.mxu0 %vm2695_vm0, %v2696_v1 }
 0x1b4   : > { %v576_v17 = vpop.f32.mrb[0].mxu1 }
 0x1b5   : > { %807 = vrot.lane.b32.xlu1 %v576_v17, %s2697_s22  ;;  %801 = vrot.lane.b32.xlu0 %v576_v17, %s2698_s13  ;;  %v499_v18 = vpop.f32.mrb[0].mxu0  ;;  %v2222_v19 = vpop.f32.mrb[1].mxu1 }
 0x1b6   : > { %v500_v20 = vadd.f32 %v2135_v16, %v499_v18  ;;  %v2211_v21 = vpop.f32.mrb[1].mxu0 }
 0x1b9   : > { %804 = vrot.lane.b32.xlu0 %v576_v17, %s2699_s26  ;;  %655 = vrot.lane.b32.xlu1 %v500_v20, %s2698_s13 }
 0x1bd   : > { %658 = vrot.lane.b32.xlu0 %v500_v20, %s2699_s26  ;;  %661 = vrot.lane.b32.xlu1 %v500_v20, %s2697_s22 }
 0x227   : > { %v808_v35 = vpop.permute.xlu1 %807  ;;  %v802_v36 = vpop.permute.xlu0 %801 }
 0x228   : > { %v826_v39 = vcombine.low %v802_v36, %v808_v35  ;;  %v827_v40 = vcombine.high %v802_v36, %v808_v35 }
 0x22a   : > { %v834_v46 = vrot.slane %v826_v39, %v3073_v38  ;;  %v841_v47 = vrot.slane %v827_v40, %v3073_v38 }
 0x22b   : > { %v805_v41 = vpop.permute.xlu0 %804  ;;  %v656_v42 = vpop.permute.xlu1 %655 }
 0x22c   : > { %v810_v43 = vcombine.low %v576_v17, %v805_v41  ;;  %v811_v44 = vcombine.high %v576_v17, %v805_v41 }
 0x22e   : > { %v818_v48 = vrot.slane %v810_v43, %v3073_v38  ;;  %v825_v49 = vrot.slane %v811_v44, %v3073_v38 }
 0x22f   : > { %v659_v50 = vpop.permute.xlu0 %658  ;;  %v662_v51 = vpop.permute.xlu1 %661 }
 0x230   : > { %v842_v52 = vcombine.low %v818_v48, %v834_v46  ;;  %v843_v53 = vcombine.high %v818_v48, %v834_v46  ;;  %v858_v54 = vcombine.low %v825_v49, %v841_v47  ;;  %v859_v55 = vcombine.high %v825_v49, %v841_v47 }
 0x231   : > { %v664_v56 = vcombine.low %v500_v20, %v659_v50  ;;  %v665_v57 = vcombine.high %v500_v20, %v659_v50  ;;  %v680_v58 = vcombine.low %v656_v42, %v662_v51  ;;  %v681_v59 = vcombine.high %v656_v42, %v662_v51 }
 0x232   : > { %v850_v60 = vrot.slane %v842_v52, %v3075_v45  ;;  %v857_v61 = vrot.slane %v843_v53, %v3075_v45  ;;  %v866_v62 = vrot.slane %v858_v54, %v3075_v45  ;;  %v873_v63 = vrot.slane %v859_v55, %v3075_v45 }
 0x233   : > { %v672_v2 = vrot.slane %v664_v56, %v3073_v38  ;;  %v679_v3 = vrot.slane %v665_v57, %v3073_v38  ;;  %v688_v4 = vrot.slane %v680_v58, %v3073_v38  ;;  %v695_v5 = vrot.slane %v681_v59, %v3073_v38  ;;  %v3129_v56 = vpop.f32.mrb[2].mxu0 }
 0x234   : > { %v878_v6 = vcombine.low %v850_v60, %v857_v61  ;;  %v2141_v7 = vcombine.high %v850_v60, %v857_v61  ;;  %v894_v8 = vcombine.low %v866_v62, %v873_v63  ;;  %v2142_v9 = vcombine.high %v866_v62, %v873_v63  ;;  %v2233_v57 = vpop.f32.mrb[3].mxu0 }
 0x235   : > { %v696_v10 = vcombine.low %v672_v2, %v688_v4  ;;  %v697_v11 = vcombine.high %v672_v2, %v688_v4  ;;  %v712_v12 = vcombine.low %v679_v3, %v695_v5  ;;  %v713_v13 = vcombine.high %v679_v3, %v695_v5 }
 0x236   : > { %v885_v14 = vrot.slane %v878_v6, %v3073_v38  ;;  %v893_v15 = vrot.slane %v2141_v7, %v3073_v38  ;;  %v901_v16 = vrot.slane %v894_v8, %v3073_v38  ;;  %v909_v17 = vrot.slane %v2142_v9, %v3073_v38 }
 0x237   : > { %v704_v18 = vrot.slane %v696_v10, %v3075_v45  ;;  %v711_v19 = vrot.slane %v697_v11, %v3075_v45  ;;  %v720_v20 = vrot.slane %v712_v12, %v3075_v45  ;;  %v727_v21 = vrot.slane %v713_v13, %v3075_v45 }
 0x238   : > { %v910_v22 = vcombine.low %v885_v14, %v893_v15  ;;  %v926_v23 = vcombine.low %v901_v16, %v909_v17  ;;  %v911_v37 = vcombine.high %v885_v14, %v893_v15  ;;  %v927_v39 = vcombine.high %v901_v16, %v909_v17 }
 0x239   : > { %v732_v24 = vcombine.low %v704_v18, %v711_v19  ;;  %v2139_v25 = vcombine.high %v704_v18, %v711_v19  ;;  %v748_v26 = vcombine.low %v720_v20, %v727_v21  ;;  %v2140_v27 = vcombine.high %v720_v20, %v727_v21 }
 0x23a   : > { %v918_v28 = vrot.slane %v910_v22, %v3075_v45  ;;  %v934_v29 = vrot.slane %v926_v23, %v3075_v45  ;;  %v925_v47 = vrot.slane %v911_v37, %v3075_v45  ;;  %v941_v48 = vrot.slane %v927_v39, %v3075_v45 }
 0x23b   : > { %v739_v30 = vrot.slane %v732_v24, %v3073_v38  ;;  %v747_v31 = vrot.slane %v2139_v25, %v3073_v38  ;;  %v755_v32 = vrot.slane %v748_v26, %v3073_v38  ;;  %v763_v33 = vrot.slane %v2140_v27, %v3073_v38 }
 0x23c   : > { %v942_v34 = vcombine.low %v918_v28, %v934_v29  ;;  %v943_v46 = vcombine.high %v918_v28, %v934_v29  ;;  %v944_v52 = vcombine.low %v925_v47, %v941_v48  ;;  %v945_v54 = vcombine.high %v925_v47, %v941_v48 }
 0x23d   : > { %v764_v35 = vcombine.low %v739_v30, %v747_v31  ;;  %v780_v36 = vcombine.low %v755_v32, %v763_v33  ;;  %v765_v42 = vcombine.high %v739_v30, %v747_v31  ;;  %v781_v43 = vcombine.high %v755_v32, %v763_v33 }
 0x23e   : > { %2235 = vmatpush3.xpose.msk.msra.mxu1 %vm1092_vm2, %v942_v34 }
 0x23f   : > { %2239 = vmatprep.subr.mxu1 %v2696_v1  ;;  %v772_v40 = vrot.slane %v764_v35, %v3075_v45  ;;  %v788_v41 = vrot.slane %v780_v36, %v3075_v45  ;;  %v779_v50 = vrot.slane %v765_v42, %v3075_v45  ;;  %v795_v51 = vrot.slane %v781_v43, %v3075_v45 }
 0x241   : > { %v796_v44 = vcombine.low %v772_v40, %v788_v41  ;;  %v797_v49 = vcombine.high %v772_v40, %v788_v41  ;;  %v798_v53 = vcombine.low %v779_v50, %v795_v51  ;;  %v799_v55 = vcombine.high %v779_v50, %v795_v51 }
 0x243   : > { %2237 = vmatmul.mubr.msk.f32.vlgmr.msra.gmra.mrb[2].mxu1 %vm1092_vm2, %v796_v44 }
 0x244   : > { %2240 = vmatpush3.xpose.msk.msra.mxu1 %vm1092_vm2, %v943_v46  ;;  %2241 = vmatprep.mubr.msk.f32.mxu1 %vm2695_vm0, %v2696_v1 }
 0x245   : > { %2244 = vmatprep.subr.mxu1 %v2696_v1 }
 0x247   : > { %2242 = vmatmul.mubr.msk.f32.vlgmr.msra.gmra.mrb[4].mxu1 %vm1092_vm2, %v797_v49 }
 0x248   : > { %2245 = vmatpush3.xpose.msk.msra.mxu1 %vm1092_vm2, %v944_v52  ;;  %2246 = vmatprep.mubr.msk.f32.mxu1 %vm2695_vm0, %v2696_v1 }
 0x249   : > { %2249 = vmatprep.subr.mxu1 %v2696_v1 }
 0x24b   : > { %2247 = vmatmul.mubr.msk.f32.vlgmr.msra.gmra.mrb[6].mxu1 %vm1092_vm2, %v798_v53 }
 0x24c   : > { %2250 = vmatpush3.xpose.msk.msra.mxu1 %vm1092_vm2, %v945_v54  ;;  %2251 = vmatprep.mubr.msk.f32.mxu1 %vm2695_vm0, %v2696_v1 }
 0x24d   : > { %2259 = vmatprep.subr.mxu1 %v2696_v1 }
 0x24f   : > { %2252 = vmatmul.mubr.msk.f32.vlgmr.msra.gmra.mrb[8].mxu1 %vm1092_vm2, %v799_v55 }
 0x250   : > { %2261 = vmatprep.mubr.msk.f32.mxu1 %vm2695_vm0, %v2696_v1 }
 0x316   : > { %v1165_v58 = vpop.f32.mrb[2].mxu1 }
 0x317   : > { %v2238_v59 = vpop.f32.mrb[3].mxu1  ;;  %v1397_v60 = vsel %vm1092_vm2, %v1165_v58, -inf }
 0x318   : > { %1398 = vmax.xlane.f32.xlu0 %v1397_v60 }
 0x31a   : > { %v1241_v61 = vpop.f32.mrb[4].mxu1 }
 0x31b   : > { %v2243_v62 = vpop.f32.mrb[5].mxu1  ;;  %v1400_v63 = vsel %vm1092_vm2, %v1241_v61, -inf }
 0x31c   : > { %1401 = vmax.xlane.f32.xlu1 %v1400_v63 }
 0x31e   : > { %v1317_v2 = vpop.f32.mrb[6].mxu1 }
 0x31f   : > { %v2248_v3 = vpop.f32.mrb[7].mxu1  ;;  %v1403_v4 = vsel %vm1092_vm2, %v1317_v2, -inf }
 0x320   : > { %1404 = vmax.xlane.f32.xlu0 %v1403_v4 }
 0x322   : > { %v1393_v5 = vpop.f32.mrb[8].mxu1 }
 0x323   : > { %v2253_v6 = vpop.f32.mrb[9].mxu1  ;;  %v1406_v7 = vsel %vm1092_vm2, %v1393_v5, -inf }
 0x324   : > { %1407 = vmax.xlane.f32.xlu0 %v1406_v7 }
 0x32d   : > { %947 = vrot.lane.b32.xlu1 %v3129_v56, %s2698_s13 }
 0x3a5   : > { %v1399_v8 = vpop.xlane.xlu0 %1398 }
 0x3a6   : > { %v1409_v9 = vsub.f32 %v1165_v58, %v1399_v8 }
 0x3a8   : > { %v1413_v10 = vmul.f32 1.442695, %v1409_v9 }
 0x3a9   : > { %v1402_v11 = vpop.xlane.xlu1 %1401 }
 0x3aa   : > { %2414 = vpow2.f32 %v1413_v10  ;;  %v1410_v12 = vsub.f32 %v1241_v61, %v1402_v11 }
 0x3ac   : > { %v1415_v13 = vmul.f32 1.442695, %v1410_v12 }
 0x3ad   : > { %v1405_v14 = vpop.xlane.xlu0 %1404  ;;  %v948_v28 = vpop.permute.xlu1 %947 }
 0x3ae   : > { %2416 = vpow2.f32 %v1415_v13  ;;  %v1411_v15 = vsub.f32 %v1317_v2, %v1405_v14 }
 0x3b0   : > { %v1417_v16 = vmul.f32 1.442695, %v1411_v15 }
 0x3b1   : > { %v1408_v17 = vpop.xlane.xlu0 %1407 }
 0x3b2   : > { %2418 = vpow2.f32 %v1417_v16  ;;  %v1412_v18 = vsub.f32 %v1393_v5, %v1408_v17 }
 0x3b4   : > { %v3137_v19 = vpop.eup %2414  ;;  %v1419_v20 = vmul.f32 1.442695, %v1412_v18 }
 0x3b5   : > { %v1421_v21 = vsel %vm1092_vm2, %v3137_v19, 0.0 }
 0x3b6   : > { %2420 = vpow2.f32 %v1419_v20  ;;  %1422 = vadd.xlane.f32.xlu1 %v1421_v21  ;;  %v1887_v20 = vld [vmem:[#allocation11 + $0x8] sm:$0xff] }
 0x3b8   : > { %v2417_v22 = vpop.eup %2416 }
 0x3b9   : > { %v1424_v23 = vsel %vm1092_vm2, %v2417_v22, 0.0 }
 0x3ba   : > { %1425 = vadd.xlane.f32.xlu0 %v1424_v23 }
 0x3bc   : > { %v3142_v24 = vpop.eup %2418 }
 0x3bd   : > { %v1427_v25 = vsel %vm1092_vm2, %v3142_v24, 0.0 }
 0x3be   : > { %1428 = vadd.xlane.f32.xlu1 %v1427_v25 }
 0x3c0   : > { %v3146_v26 = vpop.eup %2420 }
 0x3c1   : > { %v1430_v27 = vsel %vm1092_vm2, %v3146_v26, 0.0 }
 0x3c2   : > { %1431 = vadd.xlane.f32.xlu0 %v1430_v27 }
 0x3cf   : > { %953 = vrot.lane.b32.xlu1 %v3129_v56, %s2697_s22  ;;  %s2608_s22 = scalar_lea.vmem %s2607_s5, 256 }
 0x3d0   : > { %p2610_p7 = scmp.lt.s32.totalorder %s2608_s22, %s2602_s6 }
 0x3d2   : > { %p2611_p8 = por %p2610_p7, %p2609_p5 }
 0x3d4   : > { %p2612_p6 = pnand %p2611_p8, %p2605_p10 }
 0x3d8   : > { %950 = vrot.lane.b32.xlu0 %v3129_v56, %s2699_s26 }
 0x443   : > { %v1423_v29 = vpop.xlane.xlu1 %1422 }
 0x444   : > { %2422 = vrcp.f32 %v1423_v29 }
 0x447   : > { %v1426_v30 = vpop.xlane.xlu0 %1425 }
 0x448   : > { %2424 = vrcp.f32 %v1426_v30 }
 0x44b   : > { %v1429_v31 = vpop.xlane.xlu1 %1428 }
 0x44c   : > { %2426 = vrcp.f32 %v1429_v31 }
 0x44e   : > { %v2423_v61 = vpop.eup %2422 }
 0x44f   : > { %v1432_v32 = vpop.xlane.xlu0 %1431  ;;  %v954_v33 = vpop.permute.xlu1 %953  ;;  %v1434_v13 = vmul.f32 %v2423_v61, %v3137_v19  ;;  %v1886_v19 = vld [vmem:[#allocation11] sm:$0xff] }
 0x450   : > { %v972_v34 = vcombine.low %v948_v28, %v954_v33  ;;  %v973_v35 = vcombine.high %v948_v28, %v954_v33  ;;  %2428 = vrcp.f32 %v1432_v32  ;;  %v2304_v21 = vpack.c.bf16 %v1887_v20, %v1886_v19 }
 0x452   : > { %v980_v40 = vrot.slane %v972_v34, %v3073_v38  ;;  %v987_v41 = vrot.slane %v973_v35, %v3073_v38  ;;  %v2425_v4 = vpop.eup %2424 }
 0x453   : > { %v951_v36 = vpop.permute.xlu0 %950  ;;  %v1436_v14 = vmul.f32 %v2425_v4, %v2417_v22 }
 0x454   : > { %v956_v37 = vcombine.low %v3129_v56, %v951_v36  ;;  %v957_v39 = vcombine.high %v3129_v56, %v951_v36 }
 0x456   : > { %v964_v42 = vrot.slane %v956_v37, %v3073_v38  ;;  %v971_v43 = vrot.slane %v957_v39, %v3073_v38  ;;  %v2427_v7 = vpop.eup %2426 }
 0x457   : > { %v1438_v17 = vmul.f32 %v2427_v7, %v3142_v24 }
 0x458   : > { %v988_v44 = vcombine.low %v964_v42, %v980_v40  ;;  %v989_v46 = vcombine.high %v964_v42, %v980_v40  ;;  %v1004_v47 = vcombine.low %v971_v43, %v987_v41  ;;  %v1005_v48 = vcombine.high %v971_v43, %v987_v41  ;;  %v1888_v41 = vld [vmem:[#allocation11 + $0x10] sm:$0xff]  ;;  %v1889_v42 = vld [vmem:[#allocation11 + $0x18] sm:$0xff] }
 0x45a   : > { %v996_v49 = vrot.slane %v988_v44, %v3075_v45  ;;  %v1003_v50 = vrot.slane %v989_v46, %v3075_v45  ;;  %v1012_v51 = vrot.slane %v1004_v47, %v3075_v45  ;;  %v1019_v52 = vrot.slane %v1005_v48, %v3075_v45  ;;  %v2429_v12 = vpop.eup %2428 }
 0x45b   : > { %v1440_v18 = vmul.f32 %v2429_v12, %v3146_v26  ;;  %v2307_v48 = vpack.c.bf16 %v1889_v42, %v1888_v41 }
 0x45c   : > { %v1024_v53 = vcombine.low %v996_v49, %v1003_v50  ;;  %v2143_v54 = vcombine.high %v996_v49, %v1003_v50  ;;  %v1040_v55 = vcombine.low %v1012_v51, %v1019_v52  ;;  %v2144_v56 = vcombine.high %v1012_v51, %v1019_v52 }
 0x45e   : > { %v1031_v57 = vrot.slane %v1024_v53, %v3073_v38  ;;  %v1039_v58 = vrot.slane %v2143_v54, %v3073_v38  ;;  %v1047_v59 = vrot.slane %v1040_v55, %v3073_v38  ;;  %v1055_v60 = vrot.slane %v2144_v56, %v3073_v38 }
 0x460   : > { %v1056_v62 = vcombine.low %v1031_v57, %v1039_v58  ;;  %v1072_v63 = vcombine.low %v1047_v59, %v1055_v60  ;;  %v1057_v2 = vcombine.high %v1031_v57, %v1039_v58  ;;  %v1073_v3 = vcombine.high %v1047_v59, %v1055_v60 }
 0x462   : > { %v1064_v5 = vrot.slane %v1056_v62, %v3075_v45  ;;  %v1080_v6 = vrot.slane %v1072_v63, %v3075_v45  ;;  %v1071_v8 = vrot.slane %v1057_v2, %v3075_v45  ;;  %v1087_v9 = vrot.slane %v1073_v3, %v3075_v45 }
 0x464   : > { %v1088_v10 = vcombine.low %v1064_v5, %v1080_v6  ;;  %v1089_v11 = vcombine.high %v1064_v5, %v1080_v6  ;;  %v1090_v15 = vcombine.low %v1071_v8, %v1087_v9  ;;  %v1091_v16 = vcombine.high %v1071_v8, %v1087_v9 }
 0x466   : > { %2255 = vmatpush3.msra.mxu0 %v1088_v10  ;;  %2260 = vmatpush3.msra.mxu1 %v1089_v11  ;;  %v2159_v11 = vld [vmem:[%s3266_s7] ss:$0 sm:$0xff] }
 0x467   : > { %2257 = vmatmul.mubr.msk.f32.vlgmr.msra.gmra.mrb[4].mxu0 %vm1092_vm2, %v1434_v13  ;;  %2262 = vmatmul.mubr.msk.f32.vlgmr.msra.gmra.mrb[10].mxu1 %vm1092_vm2, %v1436_v14 }
 0x468   : > { %2264 = vmatprep.subr.mxu0 %v2696_v1  ;;  %2269 = vmatprep.subr.mxu1 %v2696_v1 }
 0x469   : > { %2265 = vmatpush3.msra.mxu0 %v1090_v15  ;;  %2270 = vmatpush3.msra.mxu1 %v1091_v16 }
 0x46a   : > { %2266 = vmatprep.mubr.msk.f32.mxu0 %vm2695_vm0, %v2696_v1  ;;  %2271 = vmatprep.mubr.msk.f32.mxu1 %vm2695_vm0, %v2696_v1 }
 0x46b   : > { %2267 = vmatmul.mubr.msk.f32.vlgmr.msra.gmra.mrb[6].mxu0 %vm1092_vm2, %v1438_v17  ;;  %2272 = vmatmul.mubr.msk.f32.vlgmr.msra.gmra.mrb[12].mxu1 %vm1092_vm2, %v1440_v18 }
 0x46c   : > { %2303 = vmatprep.subr.bf16.mxu0 %v2694_v0  ;;  %2282 = vmatprep.mubr.msk.f32.mxu0 %vm2695_vm0, %v2696_v1 }
 0x46d   : > { %2305 = vmatpush3.bf16.msra.mxu0 %v2304_v21 }
 0x46e   : > { %2306 = vmatprep.subr.bf16.mxu0 %v2694_v0 }
 0x471   : > { %2308 = vmatpush3.bf16.msra.mxu0 %v2307_v48 }
 0x53a   : > { %v1510_v22 = vpop.f32.mrb[4].mxu0  ;;  %v1583_v23 = vpop.f32.mrb[10].mxu1 }
 0x53b   : > { %v2258_v24 = vpop.f32.mrb[5].mxu0  ;;  %v2263_v25 = vpop.f32.mrb[11].mxu1 }
 0x53e   : > { %v1656_v26 = vpop.f32.mrb[6].mxu0  ;;  %v1729_v27 = vpop.f32.mrb[12].mxu1 }
 0x53f   : > { %v1733_v28 = vcombine.low %v1510_v22, %v1656_v26  ;;  %v1734_v29 = vcombine.high %v1510_v22, %v1656_v26  ;;  %v1749_v30 = vcombine.low %v1583_v23, %v1729_v27  ;;  %v1750_v31 = vcombine.high %v1583_v23, %v1729_v27  ;;  %v2268_v32 = vpop.f32.mrb[7].mxu0  ;;  %v2273_v33 = vpop.f32.mrb[13].mxu1 }
 0x541   : > { %v1741_v1 = vrot.slane %v1733_v28, %v3073_v38  ;;  %v1748_v34 = vrot.slane %v1734_v29, %v3073_v38  ;;  %v1757_v35 = vrot.slane %v1749_v30, %v3073_v38  ;;  %v1764_v0 = vrot.slane %v1750_v31, %v3073_v38 }
 0x543   : > { %v1765_v36 = vcombine.low %v1741_v1, %v1757_v35  ;;  %v1766_v37 = vcombine.high %v1741_v1, %v1757_v35  ;;  %v1781_v39 = vcombine.low %v1748_v34, %v1764_v0  ;;  %v1782_v40 = vcombine.high %v1748_v34, %v1764_v0 }
 0x545   : > { %v1773_v43 = vrot.slane %v1765_v36, %v3075_v45  ;;  %v1780_v44 = vrot.slane %v1766_v37, %v3075_v45  ;;  %v1789_v46 = vrot.slane %v1781_v39, %v3075_v45  ;;  %v1796_v47 = vrot.slane %v1782_v40, %v3075_v45 }
 0x547   : > { %v1801_v49 = vcombine.low %v1773_v43, %v1780_v44  ;;  %v2157_v50 = vcombine.high %v1773_v43, %v1780_v44  ;;  %v1817_v51 = vcombine.low %v1789_v46, %v1796_v47  ;;  %v2158_v52 = vcombine.high %v1789_v46, %v1796_v47 }
 0x549   : > { %v1808_v53 = vrot.slane %v1801_v49, %v3073_v38  ;;  %v1816_v54 = vrot.slane %v2157_v50, %v3073_v38  ;;  %v1824_v55 = vrot.slane %v1817_v51, %v3073_v38  ;;  %v1832_v56 = vrot.slane %v2158_v52, %v3073_v38 }
 0x54b   : > { %v1834_v57 = vcombine.high %v1808_v53, %v1816_v54  ;;  %v1850_v58 = vcombine.high %v1824_v55, %v1832_v56  ;;  %v1833_v59 = vcombine.low %v1808_v53, %v1816_v54  ;;  %v1849_v60 = vcombine.low %v1824_v55, %v1832_v56 }
 0x54d   : > { %v1848_v61 = vrot.slane %v1834_v57, %v3075_v45  ;;  %v1864_v62 = vrot.slane %v1850_v58, %v3075_v45  ;;  %v1841_v63 = vrot.slane %v1833_v59, %v3075_v45  ;;  %v1857_v2 = vrot.slane %v1849_v60, %v3075_v45 }
 0x54f   : > { %v1867_v3 = vcombine.low %v1848_v61, %v1864_v62  ;;  %v1866_v4 = vcombine.high %v1841_v63, %v1857_v2  ;;  %v1868_v5 = vcombine.high %v1848_v61, %v1864_v62  ;;  %v1865_v6 = vcombine.low %v1841_v63, %v1857_v2 }
 0x551   : > { %1874 = vrot.lane.b32.xlu0 %v1867_v3, %s2702_s20  ;;  %1870 = vrot.lane.b32.xlu1 %v1866_v4, %s2703_s21 }
 0x555   : > { %1878 = vrot.lane.b32.xlu1 %v1868_v5, %s2704_s4 }
 0x5c3   : > { %v1871_v38 = vpop.permute.xlu1 %1870  ;;  %v1875_v7 = vpop.permute.xlu0 %1874 }
 0x5c4   : > { %v1881_v8 = vsel %vm1092_vm2, %v1865_v6, %v1871_v38 }
 0x5c5   : > { %v1883_v9 = vsel %vm1882_vm3, %v1881_v8, %v1875_v7 }
 0x5c7   : > { %v1879_v45 = vpop.permute.xlu1 %1878 }
 0x5c8   : > { %v1885_v10 = vsel %vm1884_vm4, %v1883_v9, %v1879_v45 }
 0x5c9   : > { %2283 = vmatmul.mubr.msk.f32.vlgmr.msra.gmra.mrb[8].mxu0 %vm429_vm1, %v1885_v10 }
 0x69c   : > { %v1966_v12 = vpop.f32.mrb[8].mxu0 }
 0x69d   : > { %v1967_v13 = vadd.f32 %v2159_v11, %v1966_v12  ;;  %v2284_v14 = vpop.f32.mrb[9].mxu0 }
 0x69f   : > { %1970 = vst [vmem:[%s415_s16] sm:$0xff] %v1967_v13 }
 0x6a0   : > { %2615 = shalt.err (!%p2612_p6)
}
 0x6a1   : > { %s2616_s17 = scalar_lea.hbm %s3215_s14, 128  ;;  %s2620_s20 = scalar_lea.hbm %s3267_s8, 256 }
 0x6a2   : > { %p2617_p11 = scmp.ne.s32.totalorder %s3215_s14, %s2616_s17  ;;  %p2621_p12 = scmp.lt.u32.totalorder %s3215_s14, %s3267_s8 }
 0x6a3   : > { %p2622_p3 = scmp.lt.u32.totalorder %s2620_s20, %s2616_s17  ;;  %p2624_p0 = scmp.lt.u32.totalorder %s2616_s17, %s3215_s14 }
 0x6a4   : > { %p2618_p1 = pnand %p2617_p11, %p3298_p2 }
 0x6a5   : > { %p2623_p13 = por %p2622_p3, %p2621_p12 }
 0x6a6   : > { %p2619_p9 = pneg %p2618_p1 }
 0x6a7   : > { %p2625_p4 = por %p2624_p0, %p2623_p13 }
 0x6a9   : > { %p2626_p10 = pnand %p2625_p4, %p2619_p9 }
 0x6ab   : > { %2629 = shalt.err (!%p2626_p10)
}
 0x6ac   : > { %2329 = dma.vmem_to_hbm [thread:$0]  (%p3298_p2), %s3217_s2, 128, %s3215_s14, %s1972_s9  }
 0x6ad PF: > { %s1997_s25 = sand.u32 1, %s2672_s27   ;;  %p3299_p5 = scmp.ne.s32.totalorder %s3288_s24, 0 }
 0x6ae   : > { %p3300_p7 = scmp.ge.s32.totalorder %s2684_s30, 2  ;;  %s1998_s10 = scalar_lea.sflag [#allocation4], %s1997_s25 }
 0x6b0   : > { %p2352_p8 = pnand %p3300_p7, %p3299_p5 }
 0x6b2   : > { %2667 = dma.done.wait (!%p2352_p8), %s1998_s10, 128  }
 0x6b3   : > { %2669 = vsyncadd (!%p2352_p8), %s1998_s10, 4294967168  ;;  %s3301_s15 = sld [smem:[#allocation20_spill]]  ;;  %p26_p6 = scmp.ge.s32.totalorder %s2903_s23, 4  }
 0x6b4   : > { %s3302_s27 = smov %s2676_s28  ;;  %s3303_s28 = smov %s2680_s29 }
 0x6b5   : > { %s3305_s30 = smov %s2903_s23  ;;  %28 = sbr.rel (!%p26_p6) target bundleno = 14 (0xe), region = 126 }
 0x6b9   : > { %s3304_s29 = smov %s3301_s15 }
 0x6bc   :  { %2003 = vsyncpa [#allocation3], 1 }
 0x6bd   :  { %2005 = vsyncpa [#allocation3 + $0x1], 1 }
 0x6be   :  { %2006 = vsyncpa [#allocation6], 1 }
 0x6bf   :  { %2008 = vsyncpa [#allocation6 + $0x1], 1 }
 0x6c0   :  { %2009 = vsyncpa [#allocation9], 1 }
 0x6c1   :  { %2010 = vsyncpa [#allocation12], 1 }
 0x6c2   :  { %2011 = vsyncpa [#allocation4], 1 }
 0x6c3   :  { %2013 = vsyncpa [#allocation4 + $0x1], 1 }

</bundles_post_ra>
